<compile_context>
chip_gen: v7x
topology: tpu7x:2x2x1
jax: 0.10.0
libtpu: 0.0.40
codegen_flags: <defaults>
</compile_context>

<pallas_src>
import functools

import jax
import jax.numpy as jnp
from jax.experimental import pallas as pl
from jax.experimental.pallas import tpu as pltpu


def _round_up(n: int, m: int) -> int:
    return ((n + m - 1) // m) * m


def _fused_mlp_kernel(*refs, n_layers: int, compute_dtype):
    """refs = (x_ref, w0, b0, w1, b1, ..., w_{L-1}, b_{L-1}, o_ref).

    x_ref : (tm, in_f)    activation tile for this grid step
    w_l   : (K_l, N_l)    VMEM-resident weight (same (0,0) block every step),
                          already stored in compute_dtype
    b_l   : (1, N_l)      f32 bias, broadcasts over rows
    o_ref : (tm, out_f)
    """
    x_ref = refs[0]
    o_ref = refs[-1]
    wb = refs[1:-1]

    h = x_ref[...].astype(compute_dtype)
    for l in range(n_layers):
        w = wb[2 * l][...]          # pre-cast once at prepare time, no per-step cast
        b = wb[2 * l + 1][...]      # (1, N) f32
        # MXU matmul with f32 accumulation; bias/ReLU epilogue stays f32 (v5e-safe).
        y = jnp.dot(h, w, preferred_element_type=jnp.float32) + b
        if l < n_layers - 1:
            y = jnp.maximum(y, 0.0)
            h = y.astype(compute_dtype)   # cast only matters on the bf16 path
        else:
            h = y
    o_ref[...] = h.astype(o_ref.dtype)


def prepare_params(params, compute_dtype=jnp.float32):
    """One-time parameter prep — call OUTSIDE the per-step/per-call hot path.

    params: list of (W, b) with W as (in_dim, out_dim), b as (1, out_dim) or (out_dim,).
    Returns weights in `compute_dtype` (bf16 halves their VMEM footprint and DMA)
    and biases as (1, out_dim) f32.
    """
    prepped = []
    for w, b in params:
        prepped.append((jnp.asarray(w, compute_dtype),
                        jnp.asarray(b, jnp.float32).reshape(1, -1)))
    return prepped


def masked_network_forward(x, prepped_params, *, tile_m: int = 1024,
                           compute_dtype=jnp.float32):
    """Fused MaskedNetwork forward.

    x:              (B, in_features) float32
    prepped_params: output of prepare_params()
    compute_dtype:  jnp.float32 (exact) or jnp.bfloat16 (faster MXU path; weights
                    must have been prepared with the same dtype; accumulation,
                    bias add and ReLU remain f32).
    """
    B, in_f = x.shape
    n_layers = len(prepped_params)
    assert prepped_params[0][0].shape[0] == in_f
    out_f = prepped_params[-1][0].shape[1]

    # --- batch tile: >=2 grid steps whenever B > 8 (double-buffering + v7x megacore),
    #     rows aligned to the 8-row sublane granule, capped by tile_m. ---
    if B <= 8:
        tm = _round_up(max(B, 1), 8)
    else:
        tm = min(tile_m, _round_up(pl.cdiv(B, 2), 8))
    b_rows = _round_up(B, tm)
    # Only pad the batch when it is not a whole number of tiles (no unconditional copy).
    x_p = x if b_rows == B else jnp.zeros((b_rows, in_f), x.dtype).at[:B].set(x)

    grid = (b_rows // tm,)
    # Activations streamed per grid step; last dim equals the full array dim,
    # so no 128-lane padding is needed.
    in_specs = [pl.BlockSpec((tm, in_f), lambda i: (i, 0))]
    flat_inputs = [x_p]
    for (w, b) in prepped_params:
        # Constant (0, 0) block every grid step -> weights/biases stay VMEM-resident.
        in_specs.append(pl.BlockSpec(w.shape, lambda i: (0, 0)))
        in_specs.append(pl.BlockSpec(b.shape, lambda i: (0, 0)))
        flat_inputs += [w, b]

    kernel = functools.partial(
        _fused_mlp_kernel, n_layers=n_layers, compute_dtype=compute_dtype)

    y_p = pl.pallas_call(
        kernel,
        out_shape=jax.ShapeDtypeStruct((b_rows, out_f), x.dtype),
        grid=grid,
        in_specs=in_specs,
        out_specs=pl.BlockSpec((tm, out_f), lambda i: (i, 0)),
        compiler_params=pltpu.CompilerParams(
            # Batch grid is embarrassingly parallel -> megacore sharding on v7x.
            dimension_semantics=("parallel",),
        ),
    )(*flat_inputs)

    return y_p if b_rows == B else y_p[:B]


def init_masked_network_params(key, in_features, out_features,
                               num_hidden_layers=2, num_hidden_units=256):
    """nn.Linear-style init (uniform(-1/sqrt(fan_in), 1/sqrt(fan_in))).
    Weights stored transposed as (in_dim, out_dim), biases as (1, out_dim)."""
    dims = [in_features] + [num_hidden_units] * num_hidden_layers + [out_features]
    params = []
    for i, o in zip(dims[:-1], dims[1:]):
        key, kw, kb = jax.random.split(key, 3)
        bound = 1.0 / (float(i) ** 0.5)
        w = jax.random.uniform(kw, (i, o), jnp.float32, -bound, bound)
        b = jax.random.uniform(kb, (1, o), jnp.float32, -bound, bound)
        params.append((w, b))
    return params


def masked_network_ref(x, params):
    """Pure-JAX reference (same math as MaskedNetwork.forward)."""
    n = len(params)
    h = x
    for idx, (w, b) in enumerate(params):
        h = jnp.dot(h, w, precision=jax.lax.Precision.HIGHEST) + b
        if idx < n - 1:
            h = jnp.maximum(h, 0.0)
    return h


if __name__ == "__main__":
    key = jax.random.PRNGKey(0)

    # MaskedNetwork(in_features=16, out_features=8) with module defaults
    # (num_hidden_layers=2, num_hidden_units=256) -> Linears: 16->256->256->8.
    # TODO(synk): the `mask` property (chained abs-weight products) is not part of
    # forward(), so it is intentionally not implemented in this kernel.
    in_features, out_features = 16, 8
    num_hidden_layers, num_hidden_units = 2, 256

    key, kx = jax.random.split(key)
    params = init_masked_network_params(
        key, in_features, out_features, num_hidden_layers, num_hidden_units)
    # One-time prep (f32 exact path; pass jnp.bfloat16 here for the fast MXU path).
    prepped = prepare_params(params, compute_dtype=jnp.float32)

    # --- small batch (grid=(1,), no batch padding) ---
    batch = 8
    x = jax.random.normal(kx, (batch, in_features), jnp.float32)
    out = jax.block_until_ready(masked_network_forward(x, prepped))
    ref = masked_network_ref(x, params)
    assert out.shape == (batch, out_features)
    assert jnp.allclose(out, ref, atol=1e-4, rtol=1e-4), float(
        jnp.max(jnp.abs(out - ref)))

    # --- larger, non-multiple batch (multi-step grid, remainder padding path) ---
    key, kx2 = jax.random.split(key)
    batch2 = 300
    x2 = jax.random.normal(kx2, (batch2, in_features), jnp.float32)
    out2 = jax.block_until_ready(masked_network_forward(x2, prepped))
    ref2 = masked_network_ref(x2, params)
    assert out2.shape == (batch2, out_features)
    assert jnp.allclose(out2, ref2, atol=1e-4, rtol=1e-4), float(
        jnp.max(jnp.abs(out2 - ref2)))

    print("KERNEL_OK")
</pallas_src>

<mosaic_0001>
module attributes {stable_mosaic.version = 11 : i64} {
  func.func @_fused_mlp_kernel(%arg0: i32, %arg1: memref<8x16xf32, #tpu.memory_space<vmem>>, %arg2: memref<16x256xf32, #tpu.memory_space<vmem>>, %arg3: memref<1x256xf32, #tpu.memory_space<vmem>>, %arg4: memref<256x256xf32, #tpu.memory_space<vmem>>, %arg5: memref<1x256xf32, #tpu.memory_space<vmem>>, %arg6: memref<256x8xf32, #tpu.memory_space<vmem>>, %arg7: memref<1x8xf32, #tpu.memory_space<vmem>>, %arg8: memref<8x8xf32, #tpu.memory_space<vmem>>) attributes {dimension_semantics = [#tpu.dimension_semantics<parallel>], iteration_bounds = array<i64: 1>, scalar_prefetch = 0 : i64, scratch_operands = 0 : i64, tpu.core_type = #tpu.core_type<tc>, window_params = [{transform_indices = @transform_0, window_bounds = array<i64: 8, 16>}, {pipeline_mode = #tpu.pipeline_mode<synchronous>, transform_indices = @transform_1, window_bounds = array<i64: 16, 256>}, {pipeline_mode = #tpu.pipeline_mode<synchronous>, transform_indices = @transform_2, window_bounds = array<i64: 1, 256>}, {pipeline_mode = #tpu.pipeline_mode<synchronous>, transform_indices = @transform_3, window_bounds = array<i64: 256, 256>}, {pipeline_mode = #tpu.pipeline_mode<synchronous>, transform_indices = @transform_4, window_bounds = array<i64: 1, 256>}, {pipeline_mode = #tpu.pipeline_mode<synchronous>, transform_indices = @transform_5, window_bounds = array<i64: 256, 8>}, {pipeline_mode = #tpu.pipeline_mode<synchronous>, transform_indices = @transform_6, window_bounds = array<i64: 1, 8>}, {transform_indices = @transform_7, window_bounds = array<i64: 8, 8>}]} {
    %c0 = arith.constant 0 : index
    %c0_0 = arith.constant 0 : index
    %0 = vector.load %arg1[%c0, %c0_0] : memref<8x16xf32, #tpu.memory_space<vmem>>, vector<8x16xf32>
    %c0_1 = arith.constant 0 : index
    %c0_2 = arith.constant 0 : index
    %1 = vector.load %arg2[%c0_1, %c0_2] : memref<16x256xf32, #tpu.memory_space<vmem>>, vector<16x256xf32>
    %c0_3 = arith.constant 0 : index
    %c0_4 = arith.constant 0 : index
    %2 = vector.load %arg3[%c0_3, %c0_4] : memref<1x256xf32, #tpu.memory_space<vmem>>, vector<1x256xf32>
    %cst = arith.constant dense<0.000000e+00> : vector<8x256xf32>
    %3 = tpu.matmul %0, %1, %cst {dimension_numbers = #tpu.dot_dimension_numbers<[1], [0], [0], [1], [0, 0, 1, 1], [], []>} : vector<8x16xf32>, vector<16x256xf32>, vector<8x256xf32> -> vector<8x256xf32>
    %4 = vector.broadcast %2 : vector<1x256xf32> to vector<8x256xf32>
    %5 = arith.addf %3, %4 : vector<8x256xf32>
    %cst_5 = arith.constant 0.000000e+00 : f32
    %6 = vector.broadcast %cst_5 : f32 to vector<8x256xf32>
    %7 = arith.maximumf %5, %6 : vector<8x256xf32>
    %c0_6 = arith.constant 0 : index
    %c0_7 = arith.constant 0 : index
    %8 = vector.load %arg4[%c0_6, %c0_7] : memref<256x256xf32, #tpu.memory_space<vmem>>, vector<256x256xf32>
    %c0_8 = arith.constant 0 : index
    %c0_9 = arith.constant 0 : index
    %9 = vector.load %arg5[%c0_8, %c0_9] : memref<1x256xf32, #tpu.memory_space<vmem>>, vector<1x256xf32>
    %cst_10 = arith.constant dense<0.000000e+00> : vector<8x256xf32>
    %10 = tpu.matmul %7, %8, %cst_10 {dimension_numbers = #tpu.dot_dimension_numbers<[1], [0], [0], [1], [0, 0, 1, 1], [], []>} : vector<8x256xf32>, vector<256x256xf32>, vector<8x256xf32> -> vector<8x256xf32>
    %11 = vector.broadcast %9 : vector<1x256xf32> to vector<8x256xf32>
    %12 = arith.addf %10, %11 : vector<8x256xf32>
    %cst_11 = arith.constant 0.000000e+00 : f32
    %13 = vector.broadcast %cst_11 : f32 to vector<8x256xf32>
    %14 = arith.maximumf %12, %13 : vector<8x256xf32>
    %c0_12 = arith.constant 0 : index
    %c0_13 = arith.constant 0 : index
    %15 = vector.load %arg6[%c0_12, %c0_13] : memref<256x8xf32, #tpu.memory_space<vmem>>, vector<256x8xf32>
    %c0_14 = arith.constant 0 : index
    %c0_15 = arith.constant 0 : index
    %16 = vector.load %arg7[%c0_14, %c0_15] : memref<1x8xf32, #tpu.memory_space<vmem>>, vector<1x8xf32>
    %cst_16 = arith.constant dense<0.000000e+00> : vector<8x8xf32>
    %17 = tpu.matmul %14, %15, %cst_16 {dimension_numbers = #tpu.dot_dimension_numbers<[1], [0], [0], [1], [0, 0, 1, 1], [], []>} : vector<8x256xf32>, vector<256x8xf32>, vector<8x8xf32> -> vector<8x8xf32>
    %18 = vector.broadcast %16 : vector<1x8xf32> to vector<8x8xf32>
    %19 = arith.addf %17, %18 : vector<8x8xf32>
    %c0_17 = arith.constant 0 : index
    %c0_18 = arith.constant 0 : index
    %20 = vector.load %arg8[%c0_17, %c0_18] : memref<8x8xf32, #tpu.memory_space<vmem>>, vector<8x8xf32>
    tpu.vector_store %arg8[%c0_17, %c0_18], %19 {strides = array<i32>} : memref<8x8xf32, #tpu.memory_space<vmem>>, vector<8x8xf32>,
    return
  }
  func.func @transform_0(%arg0: i32) -> (i32, i32) {
    %c0_i32 = arith.constant 0 : i32
    %c0_i32_0 = arith.constant 0 : i32
    return %arg0, %c0_i32 : i32, i32
  }
  func.func @transform_1(%arg0: i32) -> (i32, i32) {
    %c0_i32 = arith.constant 0 : i32
    %c0_i32_0 = arith.constant 0 : i32
    %c0_i32_1 = arith.constant 0 : i32
    return %c0_i32, %c0_i32_0 : i32, i32
  }
  func.func @transform_2(%arg0: i32) -> (i32, i32) {
    %c0_i32 = arith.constant 0 : i32
    %c0_i32_0 = arith.constant 0 : i32
    %c0_i32_1 = arith.constant 0 : i32
    return %c0_i32, %c0_i32_0 : i32, i32
  }
  func.func @transform_3(%arg0: i32) -> (i32, i32) {
    %c0_i32 = arith.constant 0 : i32
    %c0_i32_0 = arith.constant 0 : i32
    %c0_i32_1 = arith.constant 0 : i32
    return %c0_i32, %c0_i32_0 : i32, i32
  }
  func.func @transform_4(%arg0: i32) -> (i32, i32) {
    %c0_i32 = arith.constant 0 : i32
    %c0_i32_0 = arith.constant 0 : i32
    %c0_i32_1 = arith.constant 0 : i32
    return %c0_i32, %c0_i32_0 : i32, i32
  }
  func.func @transform_5(%arg0: i32) -> (i32, i32) {
    %c0_i32 = arith.constant 0 : i32
    %c0_i32_0 = arith.constant 0 : i32
    %c0_i32_1 = arith.constant 0 : i32
    return %c0_i32, %c0_i32_0 : i32, i32
  }
  func.func @transform_6(%arg0: i32) -> (i32, i32) {
    %c0_i32 = arith.constant 0 : i32
    %c0_i32_0 = arith.constant 0 : i32
    %c0_i32_1 = arith.constant 0 : i32
    return %c0_i32, %c0_i32_0 : i32, i32
  }
  func.func @transform_7(%arg0: i32) -> (i32, i32) {
    %c0_i32 = arith.constant 0 : i32
    %c0_i32_0 = arith.constant 0 : i32
    return %arg0, %c0_i32 : i32, i32
  }
}

</mosaic_0001>

<bundles_post_ra>
// kernel: tpu_custom_call.1
= control target key start
LH: loop header
LB: loop body
LE: loop exit
PB: predicated region body
PF: predicated region fallthrough
CT: control target
= control target key end

     0   :  { %12 = vsyncpa [#allocation3], 0  ;;  %s789_s0 = inlined_call_operand.vmem [shape: f32[8,16], index: 0, kind: input, shape index: {}]   ;;  %s790_s1 = inlined_call_operand.vmem [shape: f32[16,256], index: 1, kind: input, shape index: {}]   ;;  %s791_s2 = inlined_call_operand.vmem [shape: f32[1,256], index: 2, kind: input, shape index: {}]   ;;  %s792_s3 = inlined_call_operand.hbm [shape: f32[256,256], index: 3, kind: input, shape index: {}]   ;;  %s793_s4 = inlined_call_operand.vmem [shape: f32[1,256], index: 4, kind: input, shape index: {}]   ;;  %s794_s5 = inlined_call_operand.vmem [shape: f32[256,8], index: 5, kind: input, shape index: {}]   ;;  %s795_s6 = inlined_call_operand.vmem [shape: f32[1,8], index: 6, kind: input, shape index: {}]   ;;  %s796_s7 = inlined_call_operand.hbm [shape: f32[8,8], index: 7, kind: output, shape index: {}]  }
   0x1   :  { %13 = vsyncpa [#allocation4], 0  ;;  %s600_s24 = smov [#allocation2]   ;;  %s552_s28 = scalar_lea.hbm %s792_s3, 8192 }
   0x2   :  { %s25_s25 = sshll.u32 %s600_s24, 4  ;;  %p553_p0 = scmp.ne.s32.totalorder %s792_s3, %s552_s28  ;;  %s26_s25 = int_to_ptr.vmem [resolvable:$true] %s25_s25 }
   0x3   :  { %p556_p1 = scmp.lt.u32.totalorder %s552_s28, %s792_s3 }
   0x5   :  { %p558_p2 = pnand %p556_p1, %p553_p0 }
   0x7   :  { %561 = shalt.err (!%p558_p2)
}
   0x8   :  { %s562_s10 = scalar_lea.vmem %s26_s25, 8192  ;;  %p567_p4 = scmp.lt.s32.totalorder %s26_s25, %s26_s25 }
   0x9   :  { %p563_p3 = scmp.ne.s32.totalorder %s26_s25, %s562_s10  ;;  %p568_p5 = scmp.lt.s32.totalorder %s562_s10, %s562_s10 }
   0xb   :  { %p569_p6 = por %p568_p5, %p567_p4 }
   0xd   :  { %p570_p7 = pnand %p569_p6, %p563_p3 }
   0xf   :  { %573 = shalt.err (!%p570_p7)
}
  0x10   :  { %s601_s11 = smov 256   ;;  %s602_s12 = smov 16  }
  0x11   :  { %31 = dma.hbm_to_vmem [thread:$0]  %s792_s3, 8192, %s26_s25, [#allocation3], %s601_s11, %s601_s11, %s602_s12  }
  0x12   :  { %596 = dma.done.wait [#allocation3], 8192  }
  0x13   :  { %597 = vsyncadd [#allocation3], 4294959104  ;;  %v603_v0 = vmov 0.0   ;;  %v43_v1 = vld [vmem:[%s790_s1 + $0x8] sm:$0xff]  ;;  %v45_v2 = vld [vmem:[%s790_s1 + $0x18] sm:$0xff]  ;;  %vm58_vm0 = vcmask 130048  }
  0x14   :  { %126 = vmatprep.mubr.f32.mxu0 %v603_v0  ;;  %v42_v3 = vld [vmem:[%s790_s1] sm:$0xff]  ;;  %v447_v4 = vpack.c.bf16 %v45_v2, %v43_v1  ;;  %v44_v5 = vld [vmem:[%s790_s1 + $0x10] sm:$0xff]  ;;  %v136_v6 = vld [vmem:[#allocation2 + $0x8] sm:$0xff]  ;;  %s604_s15 = smov [#allocation5]   ;;  %vm393_vm1 = vcmask 64512  }
  0x15   :  { %v449_v7 = vpack.c.bf16 %v44_v5, %v42_v3  ;;  %v41_v8 = vld [vmem:[%s789_s0] sm:$0xff]  ;;  %v138_v9 = vld [vmem:[#allocation2 + $0x18] sm:$0xff]  ;;  %v137_v11 = vld [vmem:[#allocation2 + $0x10] sm:$0xff]  ;;  %s401_s16 = sshll.u32 %s604_s15, 4  ;;  %s402_s16 = int_to_ptr.vmem [resolvable:$true] %s401_s16 }
  0x16   :  { %v135_v10 = vld [vmem:[#allocation2] sm:$0xff]  ;;  %448 = vmatprep.subr.bf16.mxu0 %v447_v4  ;;  %v451_v12 = vpack.c.bf16 %v138_v9, %v136_v6  ;;  %v140_v14 = vld [vmem:[#allocation2 + $0x28] sm:$0xff]  ;;  %v142_v15 = vld [vmem:[#allocation2 + $0x38] sm:$0xff]  ;;  %p579_p9 = scmp.lt.s32.totalorder %s402_s16, %s402_s16 }
  0x17   :  { %v453_v13 = vpack.c.bf16 %v137_v11, %v135_v10  ;;  %v139_v16 = vld [vmem:[#allocation2 + $0x20] sm:$0xff]  ;;  %450 = vmatpush1.bf16.msra.mxu0 %v449_v7  ;;  %v455_v17 = vpack.c.bf16 %v142_v15, %v140_v14  ;;  %v141_v18 = vld [vmem:[#allocation2 + $0x30] sm:$0xff]  ;;  %v144_v19 = vld [vmem:[#allocation2 + $0x48] sm:$0xff] }
  0x18   :  { %v146_v20 = vld [vmem:[#allocation2 + $0x58] sm:$0xff]  ;;  %452 = vmatprep.subr.bf16.mxu1 %v451_v12  ;;  %v457_v21 = vpack.c.bf16 %v141_v18, %v139_v16  ;;  %v143_v23 = vld [vmem:[#allocation2 + $0x40] sm:$0xff]  ;;  %v145_v24 = vld [vmem:[#allocation2 + $0x50] sm:$0xff] }
  0x19   :  { %454 = vmatpush1.bf16.msra.mxu1 %v453_v13  ;;  %v459_v22 = vpack.c.bf16 %v146_v20, %v144_v19  ;;  %v148_v25 = vld [vmem:[#allocation2 + $0x68] sm:$0xff]  ;;  %v150_v26 = vld [vmem:[#allocation2 + $0x78] sm:$0xff]  ;;  %v461_v27 = vpack.c.bf16 %v145_v24, %v143_v23  ;;  %v147_v29 = vld [vmem:[#allocation2 + $0x60] sm:$0xff] }
  0x1a   :  { %410 = vmatmul.mubr.msk.f32.vlgmr.msra.gmra.mrb[0].mxu0 %vm58_vm0, %v41_v8  ;;  %456 = vmatprep.subr.bf16.mxu1 %v455_v17  ;;  %v463_v28 = vpack.c.bf16 %v150_v26, %v148_v25  ;;  %v149_v30 = vld [vmem:[#allocation2 + $0x70] sm:$0xff]  ;;  %v152_v31 = vld [vmem:[#allocation2 + $0x88] sm:$0xff]  ;;  %v154_v32 = vld [vmem:[#allocation2 + $0x98] sm:$0xff] }
  0x1b   :  { %v465_v33 = vpack.c.bf16 %v149_v30, %v147_v29  ;;  %v467_v34 = vpack.c.bf16 %v154_v32, %v152_v31  ;;  %v151_v35 = vld [vmem:[#allocation2 + $0x80] sm:$0xff]  ;;  %v153_v36 = vld [vmem:[#allocation2 + $0x90] sm:$0xff]  ;;  %v156_v37 = vld [vmem:[#allocation2 + $0xa8] sm:$0xff] }
  0x1c   :  { %v158_v38 = vld [vmem:[#allocation2 + $0xb8] sm:$0xff]  ;;  %v469_v39 = vpack.c.bf16 %v153_v36, %v151_v35  ;;  %v155_v41 = vld [vmem:[#allocation2 + $0xa0] sm:$0xff]  ;;  %v157_v42 = vld [vmem:[#allocation2 + $0xb0] sm:$0xff] }
  0x1d   :  { %458 = vmatpush1.bf16.msra.mxu1 %v457_v21  ;;  %v471_v40 = vpack.c.bf16 %v158_v38, %v156_v37  ;;  %v160_v43 = vld [vmem:[#allocation2 + $0xc8] sm:$0xff]  ;;  %v162_v44 = vld [vmem:[#allocation2 + $0xd8] sm:$0xff]  ;;  %v473_v45 = vpack.c.bf16 %v157_v42, %v155_v41  ;;  %v159_v47 = vld [vmem:[#allocation2 + $0xc0] sm:$0xff] }
  0x1e   :  { %460 = vmatprep.subr.bf16.mxu1 %v459_v22  ;;  %v475_v46 = vpack.c.bf16 %v162_v44, %v160_v43  ;;  %v161_v48 = vld [vmem:[#allocation2 + $0xd0] sm:$0xff]  ;;  %v164_v49 = vld [vmem:[#allocation2 + $0xe8] sm:$0xff]  ;;  %v166_v50 = vld [vmem:[#allocation2 + $0xf8] sm:$0xff] }
  0x1f   :  { %v477_v51 = vpack.c.bf16 %v161_v48, %v159_v47  ;;  %v479_v52 = vpack.c.bf16 %v166_v50, %v164_v49  ;;  %v163_v53 = vld [vmem:[#allocation2 + $0xe0] sm:$0xff]  ;;  %v165_v54 = vld [vmem:[#allocation2 + $0xf0] sm:$0xff]  ;;  %v168_v55 = vld [vmem:[#allocation2 + $0x108] sm:$0xff] }
  0x20   :  { %v170_v56 = vld [vmem:[#allocation2 + $0x118] sm:$0xff]  ;;  %v481_v57 = vpack.c.bf16 %v165_v54, %v163_v53  ;;  %v167_v59 = vld [vmem:[#allocation2 + $0x100] sm:$0xff]  ;;  %v169_v60 = vld [vmem:[#allocation2 + $0x110] sm:$0xff] }
  0x21   :  { %462 = vmatpush1.bf16.msra.mxu1 %v461_v27  ;;  %v483_v58 = vpack.c.bf16 %v170_v56, %v168_v55  ;;  %v172_v61 = vld [vmem:[#allocation2 + $0x128] sm:$0xff]  ;;  %v174_v62 = vld [vmem:[#allocation2 + $0x138] sm:$0xff]  ;;  %v485_v63 = vpack.c.bf16 %v169_v60, %v167_v59  ;;  %v171_v1 = vld [vmem:[#allocation2 + $0x120] sm:$0xff] }
  0x22   :  { %464 = vmatprep.subr.bf16.mxu1 %v463_v28  ;;  %v487_v0 = vpack.c.bf16 %v174_v62, %v172_v61  ;;  %v173_v2 = vld [vmem:[#allocation2 + $0x130] sm:$0xff]  ;;  %v176_v3 = vld [vmem:[#allocation2 + $0x148] sm:$0xff]  ;;  %v178_v4 = vld [vmem:[#allocation2 + $0x158] sm:$0xff] }
  0x23   :  { %v489_v5 = vpack.c.bf16 %v173_v2, %v171_v1  ;;  %v491_v6 = vpack.c.bf16 %v178_v4, %v176_v3  ;;  %v175_v7 = vld [vmem:[#allocation2 + $0x140] sm:$0xff]  ;;  %v177_v8 = vld [vmem:[#allocation2 + $0x150] sm:$0xff]  ;;  %v180_v9 = vld [vmem:[#allocation2 + $0x168] sm:$0xff] }
  0x24   :  { %v182_v10 = vld [vmem:[#allocation2 + $0x178] sm:$0xff]  ;;  %v493_v11 = vpack.c.bf16 %v177_v8, %v175_v7  ;;  %v179_v13 = vld [vmem:[#allocation2 + $0x160] sm:$0xff]  ;;  %v181_v14 = vld [vmem:[#allocation2 + $0x170] sm:$0xff] }
  0x25   :  { %466 = vmatpush1.bf16.msra.mxu1 %v465_v33  ;;  %v495_v12 = vpack.c.bf16 %v182_v10, %v180_v9  ;;  %v184_v15 = vld [vmem:[#allocation2 + $0x188] sm:$0xff]  ;;  %v186_v16 = vld [vmem:[#allocation2 + $0x198] sm:$0xff]  ;;  %v497_v17 = vpack.c.bf16 %v181_v14, %v179_v13  ;;  %v183_v19 = vld [vmem:[#allocation2 + $0x180] sm:$0xff] }
  0x26   :  { %468 = vmatprep.subr.bf16.mxu1 %v467_v34  ;;  %v499_v18 = vpack.c.bf16 %v186_v16, %v184_v15  ;;  %v185_v20 = vld [vmem:[#allocation2 + $0x190] sm:$0xff]  ;;  %v188_v21 = vld [vmem:[#allocation2 + $0x1a8] sm:$0xff]  ;;  %v190_v22 = vld [vmem:[#allocation2 + $0x1b8] sm:$0xff]  ;;  %v48_v15 = vlaneseq }
  0x27   :  { %v501_v23 = vpack.c.bf16 %v185_v20, %v183_v19  ;;  %v503_v24 = vpack.c.bf16 %v190_v22, %v188_v21  ;;  %v187_v25 = vld [vmem:[#allocation2 + $0x1a0] sm:$0xff]  ;;  %v189_v26 = vld [vmem:[#allocation2 + $0x1b0] sm:$0xff]  ;;  %v192_v27 = vld [vmem:[#allocation2 + $0x1c8] sm:$0xff] }
  0x28   :  { %v194_v28 = vld [vmem:[#allocation2 + $0x1d8] sm:$0xff]  ;;  %v505_v29 = vpack.c.bf16 %v189_v26, %v187_v25  ;;  %v191_v31 = vld [vmem:[#allocation2 + $0x1c0] sm:$0xff]  ;;  %v193_v32 = vld [vmem:[#allocation2 + $0x1d0] sm:$0xff]  ;;  %v49_v16 = vshrl.u32 %v48_v15, 7 }
  0x29   :  { %470 = vmatpush1.bf16.msra.mxu1 %v469_v39  ;;  %v507_v30 = vpack.c.bf16 %v194_v28, %v192_v27  ;;  %v509_v33 = vpack.c.bf16 %v193_v32, %v191_v31  ;;  %v196_v34 = vld [vmem:[#allocation2 + $0x1e8] sm:$0xff]  ;;  %v198_v35 = vld [vmem:[#allocation2 + $0x1f8] sm:$0xff]  ;;  %v195_v37 = vld [vmem:[#allocation2 + $0x1e0] sm:$0xff] }
  0x2a   :  { %472 = vmatprep.subr.bf16.mxu1 %v471_v40  ;;  %v511_v36 = vpack.c.bf16 %v198_v35, %v196_v34  ;;  %v197_v38 = vld [vmem:[#allocation2 + $0x1f0] sm:$0xff]  ;;  %v300_v40 = vld [vmem:[%s794_s5 + $0x80] sm:$0xff]  ;;  %v301_v41 = vld [vmem:[%s794_s5 + $0x88] sm:$0xff]  ;;  %v54_v19 = vsub.s32 1, %v49_v16 }
  0x2b   :  { %v513_v39 = vpack.c.bf16 %v197_v38, %v195_v37  ;;  %v284_v42 = vld [vmem:[%s794_s5] sm:$0xff]  ;;  %v515_v43 = vpack.c.bf16 %v301_v41, %v300_v40  ;;  %v285_v44 = vld [vmem:[%s794_s5 + $0x8] sm:$0xff]  ;;  %v286_v49 = vld [vmem:[%s794_s5 + $0x10] sm:$0xff] }
  0x2c   :  { %v517_v47 = vpack.c.bf16 %v285_v44, %v284_v42  ;;  %v287_v50 = vld [vmem:[%s794_s5 + $0x18] sm:$0xff]  ;;  %v288_v55 = vld [vmem:[%s794_s5 + $0x20] sm:$0xff]  ;;  %v289_v56 = vld [vmem:[%s794_s5 + $0x28] sm:$0xff] }
  0x2d   :  { %474 = vmatpush1.bf16.msra.mxu1 %v473_v45  ;;  %v302_v45 = vld [vmem:[%s794_s5 + $0x90] sm:$0xff]  ;;  %516 = vmatprep.subr.bf16.mxu0 %v515_v43  ;;  %v521_v53 = vpack.c.bf16 %v287_v50, %v286_v49  ;;  %v525_v59 = vpack.c.bf16 %v289_v56, %v288_v55  ;;  %v291_v62 = vld [vmem:[%s794_s5 + $0x38] sm:$0xff]  ;;  %v292_v3 = vld [vmem:[%s794_s5 + $0x40] sm:$0xff] }
  0x2e   :  { %476 = vmatprep.subr.bf16.mxu1 %v475_v46  ;;  %v303_v46 = vld [vmem:[%s794_s5 + $0x98] sm:$0xff]  ;;  %518 = vmatpush3.bf16.msra.mxu0 %v517_v47  ;;  %v290_v61 = vld [vmem:[%s794_s5 + $0x30] sm:$0xff]  ;;  %v293_v4 = vld [vmem:[%s794_s5 + $0x48] sm:$0xff] }
  0x2f   :  { %v519_v48 = vpack.c.bf16 %v303_v46, %v302_v45  ;;  %v529_v1 = vpack.c.bf16 %v291_v62, %v290_v61  ;;  %v533_v7 = vpack.c.bf16 %v293_v4, %v292_v3  ;;  %v294_v9 = vld [vmem:[%s794_s5 + $0x50] sm:$0xff]  ;;  %v295_v10 = vld [vmem:[%s794_s5 + $0x58] sm:$0xff]  ;;  %v296_v28 = vld [vmem:[%s794_s5 + $0x60] sm:$0xff] }
  0x30   :  { %v537_v13 = vpack.c.bf16 %v295_v10, %v294_v9  ;;  %v314_v31 = vld [vmem:[%s794_s5 + $0xf0] sm:$0xff]  ;;  %v315_v32 = vld [vmem:[%s794_s5 + $0xf8] sm:$0xff]  ;;  %v199_v37 = vld [vmem:[%s793_s4] sm:$0x3]  ;;  %s574_s4 = scalar_lea.vmem %s402_s16, 128 }
  0x31   :  { %478 = vmatpush1.bf16.msra.mxu1 %v477_v51  ;;  %v304_v51 = vld [vmem:[%s794_s5 + $0xa0] sm:$0xff]  ;;  %520 = vmatprep.subr.bf16.mxu0 %v519_v48  ;;  %v298_v34 = vld [vmem:[%s794_s5 + $0x70] sm:$0xff]  ;;  %v299_v35 = vld [vmem:[%s794_s5 + $0x78] sm:$0xff]  ;;  %p575_p8 = scmp.ne.s32.totalorder %s402_s16, %s574_s4  ;;  %p580_p10 = scmp.lt.s32.totalorder %s574_s4, %s574_s4 }
  0x32   :  { %480 = vmatprep.subr.bf16.mxu1 %v479_v52  ;;  %v305_v52 = vld [vmem:[%s794_s5 + $0xa8] sm:$0xff]  ;;  %522 = vmatpush3.bf16.msra.mxu0 %v521_v53  ;;  %v411_v47 = vld [vmem:[%s795_s6] ss:$0 sm:$0xff] }
  0x33   :  { %v523_v54 = vpack.c.bf16 %v305_v52, %v304_v51  ;;  %p581_p11 = por %p580_p10, %p579_p9 }
  0x35   :  { %482 = vmatpush1.bf16.msra.mxu1 %v481_v57  ;;  %v306_v57 = vld [vmem:[%s794_s5 + $0xb0] sm:$0xff]  ;;  %524 = vmatprep.subr.bf16.mxu0 %v523_v54  ;;  %p582_p12 = pnand %p581_p11, %p575_p8 }
  0x36   :  { %484 = vmatprep.subr.bf16.mxu1 %v483_v58  ;;  %v307_v58 = vld [vmem:[%s794_s5 + $0xb8] sm:$0xff]  ;;  %526 = vmatpush3.bf16.msra.mxu0 %v525_v59 }
  0x37   :  { %v527_v60 = vpack.c.bf16 %v307_v58, %v306_v57 }
  0x39   :  { %486 = vmatpush1.bf16.msra.mxu1 %v485_v63  ;;  %v308_v63 = vld [vmem:[%s794_s5 + $0xc0] sm:$0xff]  ;;  %528 = vmatprep.subr.bf16.mxu0 %v527_v60 }
  0x3a   :  { %488 = vmatprep.subr.bf16.mxu1 %v487_v0  ;;  %v309_v0 = vld [vmem:[%s794_s5 + $0xc8] sm:$0xff]  ;;  %530 = vmatpush3.bf16.msra.mxu0 %v529_v1 }
  0x3b   :  { %v531_v2 = vpack.c.bf16 %v309_v0, %v308_v63 }
  0x3d   :  { %490 = vmatpush1.bf16.msra.mxu1 %v489_v5  ;;  %v310_v5 = vld [vmem:[%s794_s5 + $0xd0] sm:$0xff]  ;;  %532 = vmatprep.subr.bf16.mxu0 %v531_v2 }
  0x3e   :  { %492 = vmatprep.subr.bf16.mxu1 %v491_v6  ;;  %v311_v6 = vld [vmem:[%s794_s5 + $0xd8] sm:$0xff]  ;;  %534 = vmatpush3.bf16.msra.mxu0 %v533_v7 }
  0x3f   :  { %v535_v8 = vpack.c.bf16 %v311_v6, %v310_v5 }
  0x41   :  { %494 = vmatpush1.bf16.msra.mxu1 %v493_v11  ;;  %v312_v11 = vld [vmem:[%s794_s5 + $0xe0] sm:$0xff]  ;;  %536 = vmatprep.subr.bf16.mxu0 %v535_v8 }
  0x42   :  { %496 = vmatprep.subr.bf16.mxu1 %v495_v12  ;;  %v313_v12 = vld [vmem:[%s794_s5 + $0xe8] sm:$0xff]  ;;  %538 = vmatpush3.bf16.msra.mxu0 %v537_v13 }
  0x43   :  { %v539_v14 = vpack.c.bf16 %v313_v12, %v312_v11 }
  0x45   :  { %498 = vmatpush1.bf16.msra.mxu1 %v497_v17  ;;  %540 = vmatprep.subr.bf16.mxu0 %v539_v14  ;;  %v50_v17 = vsub.s32 0, %v49_v16 }
  0x46   :  { %500 = vmatprep.subr.bf16.mxu1 %v499_v18  ;;  %v46_v18 = vld [vmem:[%s791_s2] sm:$0x3] }
  0x47   :  { %v51_v20 = vrot.slane %v46_v18, %v50_v17  ;;  %v55_v21 = vrot.slane %v46_v18, %v54_v19  ;;  %v204_v38 = vrot.slane %v199_v37, %v50_v17 }
  0x49   :  { %502 = vmatpush1.bf16.msra.mxu1 %v501_v23 }
  0x4a   :  { %504 = vmatprep.subr.bf16.mxu1 %v503_v24 }
  0x4d   :  { %506 = vmatpush1.bf16.msra.mxu1 %v505_v29  ;;  %v297_v29 = vld [vmem:[%s794_s5 + $0x68] sm:$0xff] }
  0x4e   :  { %508 = vmatprep.subr.bf16.mxu1 %v507_v30  ;;  %v541_v30 = vpack.c.bf16 %v297_v29, %v296_v28 }
  0x50   :  { %542 = vmatpush3.bf16.msra.mxu0 %v541_v30 }
  0x51   :  { %510 = vmatpush1.bf16.msra.mxu1 %v509_v33  ;;  %v543_v33 = vpack.c.bf16 %v315_v32, %v314_v31 }
  0x52   :  { %512 = vmatprep.subr.bf16.mxu1 %v511_v36  ;;  %v545_v36 = vpack.c.bf16 %v299_v35, %v298_v34 }
  0x53   :  { %544 = vmatprep.subr.bf16.mxu0 %v543_v33 }
  0x54   :  { %546 = vmatpush3.bf16.msra.mxu0 %v545_v36 }
  0x55   :  { %514 = vmatpush1.bf16.msra.mxu1 %v513_v39  ;;  %v208_v39 = vrot.slane %v199_v37, %v54_v19 }
  0xed   :  { %v128_v22 = vpop.f32.mrb[0].mxu0 }
  0xee   :  { %v129_v23 = vadd.f32 %v128_v22, %v51_v20  ;;  %v130_v24 = vpop.f32.mrb[1].mxu0 }
  0xef   :  { %v131_v25 = vadd.f32 %v130_v24, %v55_v21 }
  0xf0   :  { %v133_v27 = vmax.f32 %v129_v23, 0.0 }
  0xf1   :  { %v134_v26 = vmax.f32 %v131_v25, 0.0 }
  0xf3   :  { %275 = vmatprep.mubr.f32.mxu1 %v134_v26 }
  0xf4   :  { %276 = vmatmul.mubr.f32.vlgmr.msra.gmra.mrb[0].mxu1 %v133_v27 }
 0x1c7   :  { %v277_v40 = vpop.f32.mrb[0].mxu1 }
 0x1c8   :  { %v278_v41 = vadd.f32 %v277_v40, %v204_v38  ;;  %v279_v42 = vpop.f32.mrb[1].mxu1 }
 0x1c9   :  { %v280_v43 = vadd.f32 %v279_v42, %v208_v39 }
 0x1ca   :  { %v282_v45 = vmax.f32 %v278_v41, 0.0 }
 0x1cb   :  { %v283_v44 = vmax.f32 %v280_v43, 0.0 }
 0x1cd   :  { %387 = vmatprep.mubr.f32.mxu0 %v283_v44 }
 0x1ce   :  { %388 = vmatmul.mubr.f32.vlgmr.msra.gmra.mrb[2].mxu0 %v282_v45 }
 0x2a1   :  { %v444_v46 = vpop.f32.mrb[2].mxu0 }
 0x2a2   :  { %v445_v48 = vpop.f32.mrb[3].mxu0 }
 0x2a3   :  { %v446_v49 = vadd.f32 %v445_v48, %v444_v46 }
 0x2a5   :  { %v390_v50 = vadd.f32 %v446_v49, %v411_v47 }
 0x2a7   :  { %394 = vst.msk [vmem:[#allocation5] sm:$0xff] %vm393_vm1, %v390_v50 }
 0x2a8   :  { %585 = shalt.err (!%p582_p12)
}
 0x2a9   :  { %s586_s19 = scalar_lea.hbm %s796_s7, 128 }
 0x2aa   :  { %p587_p13 = scmp.ne.s32.totalorder %s796_s7, %s586_s19  ;;  %p590_p0 = scmp.lt.u32.totalorder %s586_s19, %s796_s7 }
 0x2ac   :  { %p592_p1 = pnand %p590_p0, %p587_p13 }
 0x2ae   :  { %595 = shalt.err (!%p592_p1)
}
 0x2af   :  { %404 = dma.vmem_to_hbm [thread:$0]  %s402_s16, 128, %s796_s7, [#allocation4]  }
 0x2b0   :  { %598 = dma.done.wait [#allocation4], 128  }
 0x2b1   :  { %599 = vsyncadd [#allocation4], 4294967168 }
 0x2b2   :  { %408 = vsyncpa [#allocation3], 1 }
 0x2b3   :  { %409 = vsyncpa [#allocation4], 1 }

</bundles_post_ra>
